<compile_context>
chip_gen: v7x
topology: tpu7x:2x2x1
jax: 0.10.0
libtpu: 0.0.40
codegen_flags: <defaults>
</compile_context>

<pallas_src>
import functools

import jax
import jax.numpy as jnp
from jax.experimental import pallas as pl
from jax.experimental.pallas import tpu as pltpu


# ----------------------------------------------------------------------------
# Kernels
# ----------------------------------------------------------------------------
def _se_ln_fused_kernel(x_ref, gamma_ref, beta_ref, o_ref, *, inv_hw, eps):
    """One (b_tile, C, HW) block: pool -> LayerNorm(C) -> sigmoid -> scale."""
    # Global average pool over the spatial axis, f32 accumulation.
    pooled = jnp.sum(x_ref[...], axis=-1, keepdims=True,
                     dtype=jnp.float32) * inv_hw                      # (B, C, 1)
    # LayerNorm over channels (biased variance, PyTorch semantics).
    mu = jnp.mean(pooled, axis=1, keepdims=True)                      # (B, 1, 1)
    var = jnp.mean(jnp.square(pooled - mu), axis=1, keepdims=True)    # (B, 1, 1)
    norm = (pooled - mu) * jax.lax.rsqrt(var + eps)
    gate = jax.nn.sigmoid(norm * gamma_ref[...] + beta_ref[...])      # (B, C, 1) f32
    # Streaming per-channel scale; re-reading x_ref keeps the multi-MiB block's
    # live range short (vreg pressure) — the second read comes from VMEM.
    o_ref[...] = (x_ref[...] * gate).astype(o_ref.dtype)


def _pool_gate_kernel(x_ref, gamma_ref, beta_ref, gate_ref, acc_ref, *,
                      hw_total, hw_tile, inv_hw, eps, need_mask):
    """Two-pass fallback, pass A: pooled-sum accumulation over HW tiles, then
    LayerNorm + sigmoid at the last HW step. Grid = (N, n_hw_tiles)."""
    h = pl.program_id(1)

    @pl.when(h == 0)
    def _init():
        acc_ref[...] = jnp.zeros_like(acc_ref)

    x = x_ref[...]                                                    # (1, C, hw_tile)
    if need_mask:  # static: only when HW % hw_tile != 0 (partial last tile)
        idx = jax.lax.broadcasted_iota(jnp.int32, x.shape, 2) + h * hw_tile
        x = jnp.where(idx < hw_total, x, jnp.zeros_like(x))
    acc_ref[...] += jnp.sum(x, axis=-1, keepdims=True, dtype=jnp.float32)

    @pl.when(h == pl.num_programs(1) - 1)
    def _finalize():
        pooled = acc_ref[...] * inv_hw                                # (1, C, 1)
        mu = jnp.mean(pooled, axis=1, keepdims=True)
        var = jnp.mean(jnp.square(pooled - mu), axis=1, keepdims=True)
        norm = (pooled - mu) * jax.lax.rsqrt(var + eps)
        gate_ref[...] = jax.nn.sigmoid(norm * gamma_ref[...] + beta_ref[...])


def _scale_kernel(gate_ref, x_ref, o_ref):
    """Two-pass fallback, pass B: out = gate * x, HW-tiled streaming scale."""
    o_ref[...] = (x_ref[...] * gate_ref[...]).astype(o_ref.dtype)


# ----------------------------------------------------------------------------
# Per-generation configuration
# ----------------------------------------------------------------------------
def _tpu_config():
    """Block-size target / VMEM budget / batch-axis semantics per TPU gen."""
    kind = ""
    try:
        kind = jax.devices()[0].device_kind.lower()
    except Exception:
        pass
    core_parallel = getattr(pltpu, "CORE_PARALLEL", "parallel")
    if "v5" in kind:          # v5e: 16 MiB default scoped VMEM, 128 MiB physical
        return {"target_block": 2 << 20, "scoped_default": 16 << 20,
                "vmem_cap": 80 << 20, "batch_sem": "parallel"}
    if "v6" in kind:          # v6e: 32 MiB default scoped, 128 MiB physical
        return {"target_block": 4 << 20, "scoped_default": 32 << 20,
                "vmem_cap": 80 << 20, "batch_sem": "parallel"}
    if "v7" in kind or "7x" in kind:   # v7x: 64 MiB physical, 2 TCs per chip
        return {"target_block": 6 << 20, "scoped_default": 32 << 20,
                "vmem_cap": 44 << 20, "batch_sem": core_parallel}
    # Unknown generation: conservative budgets.
    return {"target_block": 2 << 20, "scoped_default": 16 << 20,
            "vmem_cap": 40 << 20, "batch_sem": "parallel"}


def _vmem_limit(est_bytes, cfg):
    """Only raise the scoped-VMEM limit when the estimate actually needs it."""
    if est_bytes > cfg["scoped_default"]:
        return int(min(est_bytes, cfg["vmem_cap"]))
    return None


# ----------------------------------------------------------------------------
# Wrappers
# ----------------------------------------------------------------------------
def _se_ln_fused(x_flat, g3, b3, eps, cfg):
    N, C, HW = x_flat.shape
    itemsize = jnp.dtype(x_flat.dtype).itemsize
    per_sample = C * HW * itemsize

    b_tile = max(1, min(cfg["target_block"] // per_sample, N))
    if N >= 2:                      # keep >= 2 grid steps (v7x: 2 TCs; pipelining)
        b_tile = min(b_tile, pl.cdiv(N, 2))
    grid = (pl.cdiv(N, b_tile),)    # partial last batch block is fine

    vmem_est = 4 * b_tile * per_sample + (1 << 20)  # in + out, double-buffered
    cost = pl.CostEstimate(flops=int(3 * N * C * HW),
                           transcendentals=int(N * C),
                           bytes_accessed=int(2 * N * C * HW * itemsize))
    kernel = functools.partial(_se_ln_fused_kernel,
                               inv_hw=float(1.0 / HW), eps=float(eps))
    return pl.pallas_call(
        kernel,
        out_shape=jax.ShapeDtypeStruct((N, C, HW), x_flat.dtype),
        grid_spec=pltpu.PrefetchScalarGridSpec(
            num_scalar_prefetch=0,
            grid=grid,
            in_specs=[
                pl.BlockSpec((b_tile, C, HW), lambda b: (b, 0, 0)),
                pl.BlockSpec((1, C, 1), lambda b: (0, 0, 0)),
                pl.BlockSpec((1, C, 1), lambda b: (0, 0, 0)),
            ],
            out_specs=pl.BlockSpec((b_tile, C, HW), lambda b: (b, 0, 0)),
        ),
        compiler_params=pltpu.CompilerParams(
            dimension_semantics=(cfg["batch_sem"],),
            vmem_limit_bytes=_vmem_limit(vmem_est, cfg),
        ),
        cost_estimate=cost,
    )(x_flat, g3, b3)


def _se_ln_two_pass(x_flat, g3, b3, eps, cfg):
    """Fallback when one (C, HW) sample is too big for the fused VMEM budget."""
    N, C, HW = x_flat.shape
    dtype = x_flat.dtype
    itemsize = jnp.dtype(dtype).itemsize

    # Spatial tile: multiple of 128 lanes (or the full HW), sized per-gen.
    max_lanes = max(128, (cfg["target_block"] // max(C * itemsize, 1)) // 128 * 128)
    hw_tile = HW if HW <= max_lanes else int(max_lanes)
    n_hw = pl.cdiv(HW, hw_tile)
    block_bytes = C * hw_tile * itemsize

    # Pass A: pooled-sum accumulation -> LayerNorm -> sigmoid gate (tiny output).
    kernel_a = functools.partial(
        _pool_gate_kernel, hw_total=HW, hw_tile=hw_tile,
        inv_hw=float(1.0 / HW), eps=float(eps),
        need_mask=bool(HW % hw_tile != 0))
    gate = pl.pallas_call(
        kernel_a,
        out_shape=jax.ShapeDtypeStruct((N, C, 1), jnp.float32),
        grid_spec=pltpu.PrefetchScalarGridSpec(
            num_scalar_prefetch=0,
            grid=(N, n_hw),
            in_specs=[
                pl.BlockSpec((1, C, hw_tile), lambda b, h: (b, 0, h)),
                pl.BlockSpec((1, C, 1), lambda b, h: (0, 0, 0)),
                pl.BlockSpec((1, C, 1), lambda b, h: (0, 0, 0)),
            ],
            out_specs=pl.BlockSpec((1, C, 1), lambda b, h: (b, 0, 0)),
            scratch_shapes=[pltpu.VMEM((1, C, 1), jnp.float32)],
        ),
        compiler_params=pltpu.CompilerParams(
            dimension_semantics=(cfg["batch_sem"], "arbitrary"),
            vmem_limit_bytes=_vmem_limit(2 * block_bytes + (1 << 20), cfg),
        ),
        cost_estimate=pl.CostEstimate(
            flops=int(N * C * HW), transcendentals=int(N * C),
            bytes_accessed=int(N * C * HW * itemsize)),
    )(x_flat, g3, b3)

    # Pass B: HW-tiled streaming per-channel scale (stays at HBM roofline).
    out_flat = pl.pallas_call(
        _scale_kernel,
        out_shape=jax.ShapeDtypeStruct((N, C, HW), dtype),
        grid_spec=pltpu.PrefetchScalarGridSpec(
            num_scalar_prefetch=0,
            grid=(N, n_hw),
            in_specs=[
                pl.BlockSpec((1, C, 1), lambda b, h: (b, 0, 0)),
                pl.BlockSpec((1, C, hw_tile), lambda b, h: (b, 0, h)),
            ],
            out_specs=pl.BlockSpec((1, C, hw_tile), lambda b, h: (b, 0, h)),
        ),
        compiler_params=pltpu.CompilerParams(
            dimension_semantics=(cfg["batch_sem"], "parallel"),
            vmem_limit_bytes=_vmem_limit(4 * block_bytes + (1 << 20), cfg),
        ),
        cost_estimate=pl.CostEstimate(
            flops=int(N * C * HW), transcendentals=0,
            bytes_accessed=int(2 * N * C * HW * itemsize)),
    )(gate, x_flat)
    return out_flat


def se_ln_forward(x, gamma, beta, *, eps=1e-5, mode="auto", block_bytes=None):
    """x: (N, C, H, W); gamma, beta: (C,). Returns (N, C, H, W)."""
    N, C, H, W = x.shape
    HW = H * W
    x_flat = x.reshape(N, C, HW)   # contiguous NCHW -> free reshape, no HBM pass

    cfg = dict(_tpu_config())
    if block_bytes is not None:    # test/override hook
        cfg["target_block"] = int(block_bytes)

    itemsize = jnp.dtype(x.dtype).itemsize
    per_sample_bytes = C * HW * itemsize

    g3 = gamma.reshape(1, C, 1).astype(jnp.float32)
    b3 = beta.reshape(1, C, 1).astype(jnp.float32)

    fused_vmem_need = 4 * per_sample_bytes + (2 << 20)
    if mode == "two_pass" or (mode == "auto" and fused_vmem_need > cfg["vmem_cap"]):
        out_flat = _se_ln_two_pass(x_flat, g3, b3, eps, cfg)
    else:
        out_flat = _se_ln_fused(x_flat, g3, b3, eps, cfg)
    return out_flat.reshape(N, C, H, W)


def se_ln_reference(x, gamma, beta, eps=1e-5):
    pooled = jnp.mean(x, axis=(2, 3))                               # (N, C)
    mu = jnp.mean(pooled, axis=-1, keepdims=True)
    var = jnp.mean(jnp.square(pooled - mu), axis=-1, keepdims=True)
    gate = jax.nn.sigmoid((pooled - mu) / jnp.sqrt(var + eps) * gamma + beta)
    return gate[:, :, None, None] * x


if __name__ == "__main__":
    key = jax.random.PRNGKey(0)
    kx, kg, kb, kx2, kg2, kb2 = jax.random.split(key, 6)

    # Primary case: SE_LN(cin=4) on a (2, 4, 16, 16) activation (fused path,
    # 2 grid steps).
    N, C, H, W = 2, 4, 16, 16
    x = jax.random.normal(kx, (N, C, H, W), dtype=jnp.float32)
    gamma = 1.0 + 0.1 * jax.random.normal(kg, (C,), dtype=jnp.float32)
    beta = 0.1 * jax.random.normal(kb, (C,), dtype=jnp.float32)

    out = jax.block_until_ready(se_ln_forward(x, gamma, beta))
    ref = se_ln_reference(x, gamma, beta)
    assert out.shape == (N, C, H, W)
    assert jnp.allclose(out, ref, atol=1e-5, rtol=1e-5), "fused mismatch"

    # Secondary case: HW not a multiple of 128 + partial batch block (fused),
    # and the two-pass fallback forced with tiny HW tiles (partial HW tile,
    # masked accumulation) to validate that code path too.
    N2, C2, H2, W2 = 3, 8, 10, 15
    x2 = jax.random.normal(kx2, (N2, C2, H2, W2), dtype=jnp.float32)
    gamma2 = 1.0 + 0.1 * jax.random.normal(kg2, (C2,), dtype=jnp.float32)
    beta2 = 0.1 * jax.random.normal(kb2, (C2,), dtype=jnp.float32)
    ref2 = se_ln_reference(x2, gamma2, beta2)

    out2 = jax.block_until_ready(se_ln_forward(x2, gamma2, beta2))
    assert jnp.allclose(out2, ref2, atol=1e-5, rtol=1e-5), "fused (odd shape) mismatch"

    out3 = jax.block_until_ready(
        se_ln_forward(x2, gamma2, beta2, mode="two_pass", block_bytes=4096))
    assert jnp.allclose(out3, ref2, atol=1e-5, rtol=1e-5), "two-pass mismatch"

    print("KERNEL_OK")
</pallas_src>

<mosaic_0001>
module attributes {stable_mosaic.version = 11 : i64} {
  func.func @_se_ln_fused_kernel(%arg0: i32, %arg1: memref<1x4x256xf32, #tpu.memory_space<vmem>>, %arg2: memref<1x4x1xf32, #tpu.memory_space<vmem>>, %arg3: memref<1x4x1xf32, #tpu.memory_space<vmem>>, %arg4: memref<1x4x256xf32, #tpu.memory_space<vmem>>) attributes {dimension_semantics = [#tpu.dimension_semantics<parallel>], iteration_bounds = array<i64: 2>, scalar_prefetch = 0 : i64, scratch_operands = 0 : i64, tpu.core_type = #tpu.core_type<tc>, window_params = [{transform_indices = @transform_0, window_bounds = array<i64: 1, 4, 256>}, {pipeline_mode = #tpu.pipeline_mode<synchronous>, transform_indices = @transform_1, window_bounds = array<i64: 1, 4, 1>}, {pipeline_mode = #tpu.pipeline_mode<synchronous>, transform_indices = @transform_2, window_bounds = array<i64: 1, 4, 1>}, {transform_indices = @transform_3, window_bounds = array<i64: 1, 4, 256>}]} {
    %c0 = arith.constant 0 : index
    %c0_0 = arith.constant 0 : index
    %c0_1 = arith.constant 0 : index
    %0 = vector.load %arg1[%c0, %c0_0, %c0_1] : memref<1x4x256xf32, #tpu.memory_space<vmem>>, vector<1x4x256xf32>
    %cst = arith.constant dense<0.000000e+00> : vector<1x4xf32>
    %1 = vector.multi_reduction <add>, %0, %cst [2] : vector<1x4x256xf32> to vector<1x4xf32>
    %2 = vector.shape_cast %1 : vector<1x4xf32> to vector<1x4x1xf32>
    %cst_2 = arith.constant 3.906250e-03 : f32
    %3 = vector.broadcast %cst_2 : f32 to vector<1x4x1xf32>
    %4 = arith.mulf %2, %3 : vector<1x4x1xf32>
    %cst_3 = arith.constant dense<0.000000e+00> : vector<1x1xf32>
    %5 = vector.multi_reduction <add>, %4, %cst_3 [1] : vector<1x4x1xf32> to vector<1x1xf32>
    %6 = vector.shape_cast %5 : vector<1x1xf32> to vector<1x1x1xf32>
    %cst_4 = arith.constant 4.000000e+00 : f32
    %7 = vector.broadcast %cst_4 : f32 to vector<1x1x1xf32>
    %8 = arith.divf %6, %7 : vector<1x1x1xf32>
    %9 = vector.broadcast %8 : vector<1x1x1xf32> to vector<1x4x1xf32>
    %10 = arith.subf %4, %9 : vector<1x4x1xf32>
    %11 = arith.mulf %10, %10 : vector<1x4x1xf32>
    %cst_5 = arith.constant dense<0.000000e+00> : vector<1x1xf32>
    %12 = vector.multi_reduction <add>, %11, %cst_5 [1] : vector<1x4x1xf32> to vector<1x1xf32>
    %13 = vector.shape_cast %12 : vector<1x1xf32> to vector<1x1x1xf32>
    %cst_6 = arith.constant 4.000000e+00 : f32
    %14 = vector.broadcast %cst_6 : f32 to vector<1x1x1xf32>
    %15 = arith.divf %13, %14 : vector<1x1x1xf32>
    %16 = vector.broadcast %8 : vector<1x1x1xf32> to vector<1x4x1xf32>
    %17 = arith.subf %4, %16 : vector<1x4x1xf32>
    %cst_7 = arith.constant 9.99999974E-6 : f32
    %18 = vector.broadcast %cst_7 : f32 to vector<1x1x1xf32>
    %19 = arith.addf %15, %18 : vector<1x1x1xf32>
    %20 = math.rsqrt %19 : vector<1x1x1xf32>
    %21 = vector.broadcast %20 : vector<1x1x1xf32> to vector<1x4x1xf32>
    %22 = arith.mulf %17, %21 : vector<1x4x1xf32>
    %c0_8 = arith.constant 0 : index
    %c0_9 = arith.constant 0 : index
    %c0_10 = arith.constant 0 : index
    %23 = vector.load %arg2[%c0_8, %c0_9, %c0_10] : memref<1x4x1xf32, #tpu.memory_space<vmem>>, vector<1x4x1xf32>
    %24 = arith.mulf %22, %23 : vector<1x4x1xf32>
    %c0_11 = arith.constant 0 : index
    %c0_12 = arith.constant 0 : index
    %c0_13 = arith.constant 0 : index
    %25 = vector.load %arg3[%c0_11, %c0_12, %c0_13] : memref<1x4x1xf32, #tpu.memory_space<vmem>>, vector<1x4x1xf32>
    %26 = arith.addf %24, %25 : vector<1x4x1xf32>
    %27 = arith.negf %26 : vector<1x4x1xf32>
    %28 = math.exp %27 : vector<1x4x1xf32>
    %cst_14 = arith.constant 1.000000e+00 : f32
    %29 = vector.broadcast %cst_14 : f32 to vector<1x4x1xf32>
    %30 = arith.addf %29, %28 : vector<1x4x1xf32>
    %31 = arith.divf %29, %30 : vector<1x4x1xf32>
    %c0_15 = arith.constant 0 : index
    %c0_16 = arith.constant 0 : index
    %c0_17 = arith.constant 0 : index
    %32 = vector.load %arg1[%c0_15, %c0_16, %c0_17] : memref<1x4x256xf32, #tpu.memory_space<vmem>>, vector<1x4x256xf32>
    %33 = vector.broadcast %31 : vector<1x4x1xf32> to vector<1x4x256xf32>
    %34 = arith.mulf %32, %33 : vector<1x4x256xf32>
    %c0_18 = arith.constant 0 : index
    %c0_19 = arith.constant 0 : index
    %c0_20 = arith.constant 0 : index
    %35 = vector.load %arg4[%c0_18, %c0_19, %c0_20] : memref<1x4x256xf32, #tpu.memory_space<vmem>>, vector<1x4x256xf32>
    tpu.vector_store %arg4[%c0_18, %c0_19, %c0_20], %34 {strides = array<i32>} : memref<1x4x256xf32, #tpu.memory_space<vmem>>, vector<1x4x256xf32>,
    return
  }
  func.func @transform_0(%arg0: i32) -> (i32, i32, i32) {
    %c0_i32 = arith.constant 0 : i32
    %c0_i32_0 = arith.constant 0 : i32
    %c0_i32_1 = arith.constant 0 : i32
    return %arg0, %c0_i32, %c0_i32_0 : i32, i32, i32
  }
  func.func @transform_1(%arg0: i32) -> (i32, i32, i32) {
    %c0_i32 = arith.constant 0 : i32
    %c0_i32_0 = arith.constant 0 : i32
    %c0_i32_1 = arith.constant 0 : i32
    %c0_i32_2 = arith.constant 0 : i32
    return %c0_i32, %c0_i32_0, %c0_i32_1 : i32, i32, i32
  }
  func.func @transform_2(%arg0: i32) -> (i32, i32, i32) {
    %c0_i32 = arith.constant 0 : i32
    %c0_i32_0 = arith.constant 0 : i32
    %c0_i32_1 = arith.constant 0 : i32
    %c0_i32_2 = arith.constant 0 : i32
    return %c0_i32, %c0_i32_0, %c0_i32_1 : i32, i32, i32
  }
  func.func @transform_3(%arg0: i32) -> (i32, i32, i32) {
    %c0_i32 = arith.constant 0 : i32
    %c0_i32_0 = arith.constant 0 : i32
    %c0_i32_1 = arith.constant 0 : i32
    return %arg0, %c0_i32, %c0_i32_0 : i32, i32, i32
  }
}

</mosaic_0001>

<bundles_post_ra>
// kernel: tpu_custom_call.1
= control target key start
LH: loop header
LB: loop body
LE: loop exit
PB: predicated region body
PF: predicated region fallthrough
CT: control target
= control target key end

     0   :  { %8 = vsyncpa [#allocation3], 0  ;;  %s699_s0 = inlined_call_operand.hbm [shape: f32[2,4,256], index: 0, kind: input, shape index: {}]   ;;  %s700_s1 = inlined_call_operand.vmem [shape: f32[1,4,1], index: 1, kind: input, shape index: {}]   ;;  %s701_s2 = inlined_call_operand.vmem [shape: f32[1,4,1], index: 2, kind: input, shape index: {}]   ;;  %s702_s3 = inlined_call_operand.hbm [shape: f32[2,4,256], index: 3, kind: output, shape index: {}]  }
   0x1   :  { %10 = vsyncpa [#allocation3 + $0x1], 0 }
   0x2   :  { %11 = vsyncpa [#allocation4], 0 }
   0x3   :  { %13 = vsyncpa [#allocation4 + $0x1], 0  ;;  %s524_s12 = smov 0   ;;  %s526_s13 = smov 0  }
   0x4   :  { %s528_s14 = smov 0   ;;  %s530_s15 = smov 0  }
   0x5 LB: > { %s545_s16 = sadd.s32 4294967295, %s498_s15   ;;  %s329_s17 = sadd.s32 4294967294, %s498_s15   ;;  %s498_s15 = sphi %s530_s15, %s717_s15   ;;  %s494_s14 = sphi %s528_s14, %s716_s14   ;;  %s490_s13 = sphi %s526_s13, %s715_s13   ;;  %s486_s12 = sphi %s524_s12, %s714_s12  }
   0x6   : > { %s549_s18 = sadd.s32 1, %s498_s15   ;;  %s26_s19 = sadd.s32 1, %s494_s14 }
   0x7   : > { %s23_s20 = ssub.s32 %s498_s15, %s549_s18  ;;  %p33_p0 = scmp.ne.s32.totalorder %s494_s14, %s490_s13 }
   0x8   : > { %p24_p1 = scmp.eq.s32.totalorder %s23_s20, 0  ;;  %p34_p2 = scmp.eq.s32.totalorder %s498_s15, 0 }
   0x9   : > { %p39_p3 = scmp.ne.s32.totalorder %s490_s13, %s486_s12  ;;  %p40_p4 = scmp.eq.s32.totalorder %s545_s16, 0 }
   0xa   : > { %s561_s21 = scalar_select %p24_p1, %s494_s14, %s26_s19  }
   0xb   : > { %p563_p5 = por %p34_p2, %p33_p0  ;;  %p567_p6 = por %p40_p4, %p39_p3 }
   0xc   : > { %p105_p7 = scmp.eq.s32.totalorder %s545_s16, 1  ;;  %p111_p8 = scmp.eq.s32.totalorder %s329_s17, 1 }
   0xd   : > { %p358_p10 = scmp.lt.s32.totalorder %s498_s15, 2  ;;  %s137_s26 = sand.u32 1, %s494_s14  }
   0xe   : > { %p574_p11 = por %p105_p7, %p33_p0  ;;  %p578_p12 = por %p111_p8, %p39_p3 }
   0xf   : > { %s344_s27 = sshll.u32 %s498_s15, 7  ;;  %s332_s28 = sshll.u32 %s137_s26, 3 }
  0x10   : > { %s706_s24 = scalar_select %p574_p11, 1, 0 }
  0x11   : > { %s707_s25 = scalar_select %p578_p12, 1, 0 }
  0x12   : > { %s587_s4 = scalar_lea.hbm %s699_s0, %s344_s27  ;;  %s141_s5 = scalar_lea.vmem [#allocation2], %s332_s28 }
  0x13   : > { %s149_s6 = sshll.u32 %s141_s5, 4  ;;  %p591_p13 = pnand %p358_p10, %p563_p5  ;;  %s595_s6 = int_to_ptr.vmem [resolvable:$true] %s149_s6 }
  0x14   : > { %s138_s8 = scalar_lea.sflag [#allocation3], %s137_s26  ;;  %s402_s9 = scalar_lea.hbm %s587_s4, 128 }
  0x15   : > { %p403_p2 = scmp.ne.s32.totalorder %s587_s4, %s402_s9  ;;  %p404_p3 = pneg %p591_p13 }
  0x16   : > { %s407_s17 = scalar_lea.hbm %s699_s0, 256  ;;  %p408_p5 = scmp.lt.u32.totalorder %s587_s4, %s699_s0 }
  0x17   : > { %p405_p4 = pnand %p404_p3, %p403_p2  ;;  %p409_p8 = scmp.lt.u32.totalorder %s407_s17, %s402_s9 }
  0x18   : > { %p411_p9 = scmp.lt.u32.totalorder %s402_s9, %s587_s4 }
  0x19   : > { %p406_p7 = pneg %p405_p4  ;;  %p410_p10 = por %p409_p8, %p408_p5 }
  0x1b   : > { %p412_p0 = por %p411_p9, %p410_p10 }
  0x1d   : > { %p413_p1 = pnand %p412_p0, %p406_p7 }
  0x1f   : > { %416 = shalt.err (!%p413_p1)
}
  0x20   : > { %s417_s22 = scalar_lea.vmem %s595_s6, 128  ;;  %s500_s26 = smov [#allocation2]  }
  0x21   : > { %p418_p2 = scmp.ne.s32.totalorder %s595_s6, %s417_s22  ;;  %s422_s27 = sshll.u32 %s500_s26, 4  ;;  %s423_s27 = int_to_ptr.vmem [resolvable:$false] %s422_s27 }
  0x22   : > { %s424_s28 = scalar_lea.vmem %s423_s27, 256  ;;  %p425_p11 = scmp.lt.s32.totalorder %s595_s6, %s423_s27 }
  0x23   : > { %p420_p4 = pnand %p418_p2, %p404_p3  ;;  %p426_p5 = scmp.lt.s32.totalorder %s424_s28, %s417_s22 }
  0x25   : > { %p421_p12 = pneg %p420_p4  ;;  %p427_p8 = por %p426_p5, %p425_p11 }
  0x27   : > { %p428_p9 = pnand %p427_p8, %p421_p12 }
  0x29   : > { %431 = shalt.err (!%p428_p9)
}
  0x2a   : > { %353 = dma.hbm_to_vmem [thread:$0]  (!%p591_p13), %s587_s4, 128, %s595_s6, %s138_s8  }
  0x2b   : > { %p709_p0 = scmp.lt.s32.totalorder %s498_s15, 3  ;;  %p710_p1 = scmp.ge.s32.totalorder %s498_s15, 1 }
  0x2d   : > { %p155_p3 = pnand %p710_p1, %p709_p0 }
  0x2e   : > { %s629_s29 = sand.u32 (!%p155_p3), 1, %s490_s13  }
  0x2f   : > { %158 = sbr.rel (%p155_p3) target bundleno = 430 (0x1ae), region = 32  ;;  %s336_s30 = sshll.u32 (!%p155_p3), %s629_s29, 3 }
  0x30   : > { %s161_s5 = scalar_lea.sflag (!%p155_p3), [#allocation3], %s629_s29  ;;  %s164_s7 = scalar_lea.vmem (!%p155_p3), [#allocation2], %s336_s30 }
  0x36   : > { %477 = dma.done.wait (%p567_p6), %s161_s5, 128  }
  0x37   : > { %479 = vsyncadd (%p567_p6), %s161_s5, 4294967168  ;;  %vm191_vm0 = vcmask 1043456   ;;  %v187_v0 = vld [vmem:[%s164_s7] sm:$0xff]  ;;  %v501_v5 = vmov 0   ;;  %v502_v37 = vmov 839922192   ;;  %v237_v39 = vlaneseq }
  0x38   : > { %v189_v1 = vcombine.high %v187_v0, %v187_v0  ;;  %v192_v2 = vsel %vm191_vm0, %v187_v0, 0.0  ;;  %394 = vset.pattern.permute.xlu0 %v501_v5  ;;  %v220_v28 = vld [vmem:[%s700_s1] sm:$0xf]  ;;  %v235_v38 = vunpack.c.l.s4 %v502_v37  ;;  %s345_s9 = sshll.u32 %s545_s16, 7  ;;  %s186_s10 = scalar_lea.vmem [#allocation5], %s336_s30 }
  0x39   : > { %v222_v30 = vld [vmem:[%s701_s2] sm:$0xf]  ;;  %v238_v41 = vshrl.u32 %v237_v39, 7  ;;  %s259_s11 = sshll.u32 %s186_s10, 4  ;;  %s655_s20 = scalar_lea.hbm %s702_s3, %s345_s9  ;;  %s657_s11 = int_to_ptr.vmem [resolvable:$true] %s259_s11 }
  0x3a   : > { %v193_v3 = vsel %vm191_vm0, %v189_v1, 0.0  ;;  %v236_v40 = vunpack.c.0.s8 %v235_v38  ;;  %s245_s22 = scalar_lea.sflag [#allocation4], %s629_s29  ;;  %s432_s26 = scalar_lea.vmem %s657_s11, 128 }
  0x3b   : > { %v194_v4 = vadd.f32 %v193_v3, %v192_v2  ;;  %p433_p6 = scmp.ne.s32.totalorder %s657_s11, %s432_s26  ;;  %p711_p11 = scmp.ne.s32.totalorder %s706_s24, 0 }
  0x3c   : > { %v239_v42 = vsub.s32 %v236_v40, %v238_v41  ;;  %s503_s16 = smov [#allocation5]  }
  0x3d   : > { %195 = vadd.xlane.f32.xlu0 %v194_v4  ;;  %p434_p12 = pnand %p433_p6, %p711_p11  ;;  %s436_s27 = sshll.u32 %s503_s16, 4  ;;  %s437_s27 = int_to_ptr.vmem [resolvable:$false] %s436_s27 }
  0x3e   : > { %s438_s28 = scalar_lea.vmem %s437_s27, 256  ;;  %p439_p7 = scmp.lt.s32.totalorder %s657_s11, %s437_s27 }
  0x3f   : > { %p435_p13 = pneg %p434_p12  ;;  %p440_p10 = scmp.lt.s32.totalorder %s438_s28, %s432_s26 }
  0x41   : > { %p441_p2 = por %p440_p10, %p439_p7 }
  0x43   : > { %p442_p4 = pnand %p441_p2, %p435_p13 }
  0xca   : > { %v196_v6 = vpop.xlane.xlu0 %195 }
  0xcb   : > { %v197_v7 = vmul.f32 0.00390625, %v196_v6 }
  0xcd   : > { %v198_v8 = vsel %vm191_vm0, %v197_v7, 0.0 }
  0xce   : > { %v199_v9 = vrot.slane %v198_v8, 4 }
  0xd0   : > { %v200_v10 = vadd.f32 %v199_v9, %v198_v8 }
  0xd2   : > { %v201_v11 = vrot.slane %v200_v10, 2 }
  0xd4   : > { %v202_v12 = vadd.f32 %v201_v11, %v200_v10 }
  0xd6   : > { %v203_v13 = vrot.slane %v202_v12, 1 }
  0xd8   : > { %v204_v14 = vadd.f32 %v203_v13, %v202_v12 }
  0xda   : > { %v206_v15 = vmul.f32 0.25, %v204_v14 }
  0xdc   : > { %v207_v16 = vsub.f32 %v197_v7, %v206_v15 }
  0xde   : > { %v208_v17 = vmul.f32 %v207_v16, %v207_v16 }
  0xe0   : > { %v209_v18 = vsel %vm191_vm0, %v208_v17, 0.0 }
  0xe1   : > { %v210_v19 = vrot.slane %v209_v18, 4 }
  0xe3   : > { %v211_v20 = vadd.f32 %v210_v19, %v209_v18 }
  0xe5   : > { %v212_v21 = vrot.slane %v211_v20, 2 }
  0xe7   : > { %v213_v22 = vadd.f32 %v212_v21, %v211_v20 }
  0xe9   : > { %v214_v23 = vrot.slane %v213_v22, 1 }
  0xeb   : > { %v215_v24 = vadd.f32 %v214_v23, %v213_v22 }
  0xed   : > { %v216_v25 = vmul.f32 0.25, %v215_v24 }
  0xef   : > { %v217_v26 = vadd.f32 1e-05, %v216_v25 }
  0xf1   : > { %396 = vrsqrt.f32 %v217_v26 }
  0xfb   : > { %v397_v27 = vpop.eup %396 }
  0xfc   : > { %v219_v29 = vmul.f32 %v397_v27, %v207_v16 }
  0xfe   : > { %v221_v31 = vmul.f32 %v220_v28, %v219_v29 }
 0x100   : > { %v223_v32 = vadd.f32 %v222_v30, %v221_v31 }
 0x102   : > { %v338_v33 = vmul.f32 -1.442695, %v223_v32 }
 0x104   : > { %398 = vpow2.f32 %v338_v33 }
 0x10e   : > { %v399_v34 = vpop.eup %398 }
 0x10f   : > { %v227_v35 = vadd.f32 1.0, %v399_v34 }
 0x111   : > { %400 = vrcp.f32 %v227_v35 }
 0x11b   : > { %v401_v36 = vpop.eup %400 }
 0x11c   : > { %232 = vperm.xlu0 %394, %v401_v36  }
 0x19b   : > { %v233_v43 = vpop.permute.xlu0 %232 }
 0x19c   : > { %v240_v44 = vrot.slane %v233_v43, %v239_v42 }
 0x19e   : > { %v242_v45 = vmul.f32 %v240_v44, %v187_v0 }
 0x1a0   : > { %243 = vst [vmem:[%s186_s10] sm:$0xff] %v242_v45 }
 0x1a1   : > { %445 = shalt.err (!%p442_p4)
}
 0x1a2   : > { %s446_s29 = scalar_lea.hbm %s655_s20, 128  ;;  %s450_s7 = scalar_lea.hbm %s702_s3, 256 }
 0x1a3   : > { %p447_p5 = scmp.ne.s32.totalorder %s655_s20, %s446_s29  ;;  %p451_p0 = scmp.lt.u32.totalorder %s655_s20, %s702_s3 }
 0x1a4   : > { %p452_p1 = scmp.lt.u32.totalorder %s450_s7, %s446_s29  ;;  %p454_p6 = scmp.lt.u32.totalorder %s446_s29, %s655_s20 }
 0x1a5   : > { %p448_p8 = pnand %p447_p5, %p711_p11 }
 0x1a6   : > { %p453_p3 = por %p452_p1, %p451_p0 }
 0x1a7   : > { %p449_p9 = pneg %p448_p8 }
 0x1a8   : > { %p455_p12 = por %p454_p6, %p453_p3 }
 0x1aa   : > { %p456_p13 = pnand %p455_p12, %p449_p9 }
 0x1ac   : > { %459 = shalt.err (!%p456_p13)
}
 0x1ad   : > { %348 = dma.vmem_to_hbm [thread:$0]  (%p711_p11), %s657_s11, 128, %s655_s20, %s245_s22  }
 0x1ae PF: > { %s271_s6 = sand.u32 1, %s486_s12   ;;  %p712_p7 = scmp.ne.s32.totalorder %s707_s25, 0 }
 0x1af   : > { %p713_p10 = scmp.ge.s32.totalorder %s498_s15, 2  ;;  %s272_s8 = scalar_lea.sflag [#allocation4], %s271_s6 }
 0x1b1   : > { %p355_p2 = pnand %p713_p10, %p712_p7 }
 0x1b3   : > { %481 = dma.done.wait (!%p355_p2), %s272_s8, 128  }
 0x1b4   : > { %483 = vsyncadd (!%p355_p2), %s272_s8, 4294967168  ;;  %p16_p4 = scmp.ge.s32.totalorder %s549_s18, 4   ;;  %s714_s12 = smov %s490_s13 }
 0x1b5   : > { %s715_s13 = smov %s494_s14  ;;  %s716_s14 = smov %s561_s21 }
 0x1b6   : > { %s717_s15 = smov %s549_s18  ;;  %18 = sbr.rel (!%p16_p4) target bundleno = 5 (0x5), region = 77 }
 0x1bd   :  { %277 = vsyncpa [#allocation3], 1 }
 0x1be   :  { %279 = vsyncpa [#allocation3 + $0x1], 1 }
 0x1bf   :  { %280 = vsyncpa [#allocation4], 1 }
 0x1c0   :  { %282 = vsyncpa [#allocation4 + $0x1], 1 }

</bundles_post_ra>
